<compile_context>
chip_gen: v5e
topology: v5e:2x2
jax: 0.10.0
libtpu: 0.0.40
codegen_flags: <defaults>
</compile_context>

<pallas_src>
import math

import jax
import jax.numpy as jnp
from jax.experimental import pallas as pl
from jax.experimental.pallas import tpu as pltpu


_TARGET_TILE_BYTES = 4 << 20   # ~4 MiB per x/out tile (amortizes ~0.35 us/step)
_RESIDENT_PE_BYTES = 8 << 20   # keep pe fully VMEM-resident up to this size
_VMEM_LIMIT_BYTES = 48 << 20   # explicit scoped-VMEM limit; safe on v5e/v6e/v7x
                               # (2x4 MiB x + 2x4 MiB out + <=8 MiB pe ~ 24 MiB)


def _pe_add_kernel(x_ref, pe_ref, o_ref):
    # x_ref / o_ref: (t_rows, cols); pe_ref: (t_rows, cols) or (rows, cols) when
    # resident.  Pure elementwise VPU add on lane-dense tiles.
    rows = x_ref.shape[0]
    o_ref[...] = (x_ref[...] + pe_ref[pl.ds(0, rows), :]).astype(o_ref.dtype)


def make_positional_encoding_table(d_model: int, max_seq_length: int,
                                   dtype=jnp.float32) -> jnp.ndarray:
    """Deterministic sinusoidal table, exactly as in the PyTorch __init__.

    Built in f32 for accuracy, then stored in the requested target dtype so the
    per-forward-call cast is not needed.
    """
    position = jnp.arange(max_seq_length, dtype=jnp.float32)[:, None]           # (L, 1)
    div_term = jnp.exp(
        jnp.arange(0, d_model, 2, dtype=jnp.float32) * -(math.log(10000.0) / d_model)
    )                                                                            # (D/2,)
    angles = position * div_term                                                 # (L, D/2)
    pe = jnp.zeros((max_seq_length, d_model), dtype=jnp.float32)
    pe = pe.at[:, 0::2].set(jnp.sin(angles))
    pe = pe.at[:, 1::2].set(jnp.cos(angles))
    return pe.astype(dtype)                                                      # (L, D)


def _lane_dense_view(S: int, D: int) -> tuple[int, int]:
    """Row-major 2-D view (rows, cols) of the (S, D) slab, lane-dense if possible."""
    if D % 128 == 0:
        return S, D
    if (S * D) % 128 == 0:
        # Fold the contiguous (S, D) slab into 128-wide rows: every store is an
        # unmasked, full-lane vst.  Works for any D (e.g. 32, 192, 320, ...).
        return (S * D) // 128, 128
    # Fallback: full-D blocks (partially masked stores, still correct).
    return S, D


def _sublane_multiple(itemsize: int) -> int:
    # Sub-32-bit dtypes pack along sublanes: 8 rows/vreg for 4-byte,
    # 16 for 2-byte (bf16/f16), 32 for 1-byte (int8/fp8).
    return {4: 8, 2: 16, 1: 32}.get(itemsize, 8)


def _row_tile(rows: int, cols: int, itemsize: int) -> int:
    """Largest sublane-aligned row tile within the per-tile VMEM budget."""
    sub = _sublane_multiple(itemsize)
    max_rows = max(sub, _TARGET_TILE_BYTES // (cols * itemsize))
    if max_rows >= rows:
        return rows  # full extent — always a legal block shape
    return max(sub, (max_rows // sub) * sub)


def positional_encoding_forward(x: jnp.ndarray, pe: jnp.ndarray) -> jnp.ndarray:
    """x: (B, S, D); pe: (max_seq_length, D). Returns x + pe[None, :S, :]."""
    B, S, D = x.shape
    max_len, d_model = pe.shape
    if d_model != D:
        raise ValueError(f"d_model mismatch: x has D={D}, pe has D={d_model}")
    if S > max_len:
        raise ValueError(f"sequence length {S} exceeds max_seq_length {max_len}")

    # Slice the table once, outside the kernel.  The table should already be in
    # x.dtype (built that way); only cast if the caller passed a mismatched one.
    pe_slice = pe[:S]
    if pe_slice.dtype != x.dtype:
        pe_slice = pe_slice.astype(x.dtype)

    rows, cols = _lane_dense_view(S, D)
    itemsize = jnp.dtype(x.dtype).itemsize
    t_rows = _row_tile(rows, cols, itemsize)

    x2 = x.reshape(B, rows, cols)
    pe2 = pe_slice.reshape(rows, cols)

    num_row_tiles = pl.cdiv(rows, t_rows)
    # Row-tile axis outermost, batch innermost: the pe block index is constant
    # across consecutive batch steps, so Pallas does not re-DMA it per batch.
    grid = (num_row_tiles, B)

    pe_bytes = rows * cols * itemsize
    if pe_bytes <= _RESIDENT_PE_BYTES:
        # Whole pe slab resident in VMEM; block index constant for every grid
        # step -> DMA'd exactly once.
        pe_spec = pl.BlockSpec((rows, cols), lambda r, b: (0, 0))
    else:
        # Tiled pe; index depends only on the outer (row) axis, so it is not
        # re-fetched while iterating the inner batch axis.
        pe_spec = pl.BlockSpec((t_rows, cols), lambda r, b: (r, 0))

    out2 = pl.pallas_call(
        _pe_add_kernel,
        out_shape=jax.ShapeDtypeStruct((B, rows, cols), x.dtype),
        grid_spec=pltpu.PrefetchScalarGridSpec(
            num_scalar_prefetch=0,
            grid=grid,
            in_specs=[
                # Batch dim squeezed (None) -> kernel sees a 2-D (t_rows, cols) tile.
                pl.BlockSpec((None, t_rows, cols), lambda r, b: (b, r, 0)),
                pe_spec,
            ],
            out_specs=pl.BlockSpec((None, t_rows, cols), lambda r, b: (b, r, 0)),
        ),
        compiler_params=pltpu.CompilerParams(
            dimension_semantics=("parallel", "parallel"),
            vmem_limit_bytes=_VMEM_LIMIT_BYTES,
        ),
    )(x2, pe2)

    return out2.reshape(B, S, D)


if __name__ == "__main__":
    # Small shapes consistent with the module's forward: (batch, seq, d_model)
    B, S, D = 2, 8, 32
    MAX_SEQ = 16

    key = jax.random.PRNGKey(0)
    x = jax.random.normal(key, (B, S, D), dtype=jnp.float32)

    pe = make_positional_encoding_table(D, MAX_SEQ, dtype=x.dtype)

    out = jax.block_until_ready(positional_encoding_forward(x, pe))

    # Reference check in plain JAX (same semantics as the PyTorch forward).
    ref = x + pe[None, :S, :].astype(jnp.float32)
    assert out.shape == (B, S, D)
    assert jnp.allclose(out, ref, atol=1e-6), "mismatch vs reference"

    print("KERNEL_OK")
</pallas_src>

<mosaic_0001>
module attributes {stable_mosaic.version = 11 : i64} {
  func.func @_pe_add_kernel(%arg0: i32, %arg1: i32, %arg2: memref<1x2x128xf32, #tpu.memory_space<vmem>>, %arg3: memref<2x128xf32, #tpu.memory_space<vmem>>, %arg4: memref<1x2x128xf32, #tpu.memory_space<vmem>>) attributes {dimension_semantics = [#tpu.dimension_semantics<parallel>, #tpu.dimension_semantics<parallel>], iteration_bounds = array<i64: 1, 2>, scalar_prefetch = 0 : i64, scratch_operands = 0 : i64, tpu.core_type = #tpu.core_type<tc>, window_params = [{transform_indices = @transform_0, window_bounds = array<i64: 1, 2, 128>}, {pipeline_mode = #tpu.pipeline_mode<synchronous>, transform_indices = @transform_1, window_bounds = array<i64: 2, 128>}, {transform_indices = @transform_2, window_bounds = array<i64: 1, 2, 128>}]} {
    %c0 = arith.constant 0 : index
    %c0_0 = arith.constant 0 : index
    %c0_1 = arith.constant 0 : index
    %0 = vector.load %arg2[%c0, %c0_0, %c0_1] : memref<1x2x128xf32, #tpu.memory_space<vmem>>, vector<1x2x128xf32>
    %1 = vector.shape_cast %0 : vector<1x2x128xf32> to vector<2x128xf32>
    %c0_2 = arith.constant 0 : index
    %c0_3 = arith.constant 0 : index
    %2 = vector.load %arg3[%c0_2, %c0_3] : memref<2x128xf32, #tpu.memory_space<vmem>>, vector<2x128xf32>
    %3 = arith.addf %1, %2 : vector<2x128xf32>
    %c0_4 = arith.constant 0 : index
    %c0_5 = arith.constant 0 : index
    %c0_6 = arith.constant 0 : index
    %4 = vector.load %arg4[%c0_4, %c0_5, %c0_6] : memref<1x2x128xf32, #tpu.memory_space<vmem>>, vector<1x2x128xf32>
    %5 = vector.shape_cast %4 : vector<1x2x128xf32> to vector<2x128xf32>
    %6 = vector.shape_cast %3 : vector<2x128xf32> to vector<1x2x128xf32>
    tpu.vector_store %arg4[%c0_4, %c0_5, %c0_6], %6 {strides = array<i32>} : memref<1x2x128xf32, #tpu.memory_space<vmem>>, vector<1x2x128xf32>,
    return
  }
  func.func @transform_0(%arg0: i32, %arg1: i32) -> (i32, i32, i32) {
    %c0_i32 = arith.constant 0 : i32
    %c0_i32_0 = arith.constant 0 : i32
    return %arg1, %arg0, %c0_i32 : i32, i32, i32
  }
  func.func @transform_1(%arg0: i32, %arg1: i32) -> (i32, i32) {
    %c0_i32 = arith.constant 0 : i32
    %c0_i32_0 = arith.constant 0 : i32
    %c0_i32_1 = arith.constant 0 : i32
    return %c0_i32, %c0_i32_0 : i32, i32
  }
  func.func @transform_2(%arg0: i32, %arg1: i32) -> (i32, i32, i32) {
    %c0_i32 = arith.constant 0 : i32
    %c0_i32_0 = arith.constant 0 : i32
    return %arg1, %arg0, %c0_i32 : i32, i32, i32
  }
}

</mosaic_0001>

<bundles_post_ra>
// kernel: tpu_custom_call.1
= control target key start
LH: loop header
LB: loop body
LE: loop exit
PB: predicated region body
PF: predicated region fallthrough
CT: control target
= control target key end

     0   :  { %7 = vsyncpa [#allocation3], 0  ;;  %s705_s0 = inlined_call_operand.hbm [shape: f32[2,2,128], index: 0, kind: input, shape index: {}]   ;;  %s706_s1 = inlined_call_operand.hbm [shape: f32[2,128], index: 1, kind: input, shape index: {}]   ;;  %s707_s2 = inlined_call_operand.hbm [shape: f32[2,2,128], index: 2, kind: output, shape index: {}]  }
   0x1   :  { %9 = vsyncpa [#allocation3 + $0x1], 0 }
   0x2   :  { %10 = vsyncpa [#allocation6], 0 }
   0x3   :  { %11 = vsyncpa [#allocation4], 0 }
   0x4   :  { %13 = vsyncpa [#allocation4 + $0x1], 0  ;;  %s556_s9 = smov 0   ;;  %s558_s10 = smov 0  }
   0x5   :  { %s560_s11 = smov 0   ;;  %s562_s12 = smov 0  }
   0x6   :  { %s564_s13 = smov 0   ;;  %s566_s14 = smov 0  }
   0x7 LB: > { %s304_s15 = sadd.s32 4294967295, %s538_s14   ;;  %s305_s16 = sadd.s32 4294967294, %s538_s14   ;;  %s538_s14 = sphi %s566_s14, %s19_s14   ;;  %s534_s13 = sphi %s564_s13, %s719_s13   ;;  %s530_s12 = sphi %s562_s12, %s718_s12   ;;  %s526_s11 = sphi %s560_s11, %s717_s11   ;;  %s522_s10 = sphi %s558_s10, %s716_s10   ;;  %s518_s9 = sphi %s556_s9, %s715_s9  }
   0x8   : > { %p53_p0 = scmp.ne.s32.totalorder %s522_s10, %s518_s9  ;;  %p590_p1 = scmp.eq.s32.totalorder %s304_s15, 0 }
   0x9   : > { %p594_p2 = scmp.eq.s32.totalorder %s304_s15, 1  ;;  %p106_p3 = scmp.eq.s32.totalorder %s305_s16, 1 }
   0xa   : > { %p600_p4 = por %p590_p1, %p53_p0  ;;  %p306_p5 = scmp.ge.s32.totalorder %s538_s14, 1 }
   0xb   : > { %p605_p6 = por %p106_p3, %p53_p0  ;;  %p113_p7 = scmp.lt.s32.totalorder %s538_s14, 3 }
   0xc   : > { %s125_s23 = sshll.u32 %s706_s1, 4  ;;  %p308_p9 = scmp.ge.s32.totalorder %s538_s14, 2  ;;  %s126_s23 = int_to_ptr.hbm [resolvable:$true] %s125_s23 }
   0xd   : > { %p613_p8 = pnand %p306_p5, %p113_p7  ;;  %s540_s25 = smov [#allocation5]  }
   0xe   : > { %s127_s26 = sshll.u32 %s540_s25, 4  ;;  %s28_s27 = sadd.s32 1, %s534_s13  ;;  %s128_s26 = int_to_ptr.vmem [resolvable:$true] %s127_s26 }
   0xf   : > { %p327_p10 = pneg %p613_p8  ;;  %p29_p12 = scmp.ge.s32.totalorder %s28_s27, 2 }
  0x10   : > { %s40_s28 = sadd.s32 1, %s526_s11  ;;  %p47_p13 = scmp.ne.s32.totalorder %s526_s11, %s522_s10 }
  0x11   : > { %p328_p11 = pnand %p327_p10, %p590_p1  ;;  %p48_p0 = scmp.eq.s32.totalorder %s538_s14, 0 }
  0x12   : > { %s721_s27 = smov (%p29_p12, %s28_s27), 0  ;;  %p635_p5 = por %p594_p2, %p47_p13 }
  0x13   : > { %330 = dma.hbm_to_vmem [thread:$0]  (!%p328_p11), %s126_s23, 32, %s128_s26, [#allocation6]  }
  0x14   : > { %p629_p3 = por %p48_p0, %p47_p13  ;;  %s35_s3 = ssub.s32 %s534_s13, %s721_s27 }
  0x15   : > { %p340_p7 = scmp.lt.s32.totalorder %s538_s14, 2  ;;  %p38_p10 = scmp.eq.s32.totalorder %s35_s3, 0 }
  0x16   : > { %s138_s4 = sand.u32 1, %s526_s11   ;;  %s310_s7 = sshll.u32 %s534_s13, 1 }
  0x17   : > { %s309_s5 = sshll.u32 %s138_s4, 1  ;;  %s147_s16 = scalar_lea.hbm %s705_s0, %s310_s7 }
  0x18   : > { %s644_s6 = scalar_select %p38_p10, %s526_s11, %s40_s28  }
  0x19   : > { %s142_s21 = scalar_lea.vmem [#allocation2], %s309_s5  ;;  %s149_s18 = sshll.u32 %s147_s16, 4  ;;  %s150_s18 = int_to_ptr.hbm [resolvable:$true] %s149_s18 }
  0x1a   : > { %s151_s22 = sshll.u32 %s142_s21, 4  ;;  %p332_p2 = pnand %p340_p7, %p629_p3  ;;  %s152_s22 = int_to_ptr.vmem [resolvable:$true] %s151_s22 }
  0x1b   : > { %s139_s23 = scalar_lea.sflag [#allocation3], %s138_s4  ;;  %160 = sbr.rel (%p613_p8) target bundleno = 50 (0x32), region = 28 }
  0x1c   : > { %334 = dma.hbm_to_vmem [thread:$0]  (!%p332_p2), %s150_s18, 32, %s152_s22, %s139_s23  }
  0x1d   : > { %s655_s25 = sand.u32 (!%p613_p8), 1, %s522_s10  }
  0x1e   : > { %s312_s26 = sshll.u32 (!%p613_p8), %s655_s25, 1  ;;  %s163_s28 = scalar_lea.sflag (!%p613_p8), [#allocation3], %s655_s25 }
  0x1f   : > { %s166_s3 = scalar_lea.vmem (!%p613_p8), [#allocation2], %s312_s26 }
  0x20   : > { %505 = dma.done.wait (%p600_p4), %s163_s28, 32  }
  0x21   : > { %507 = vsyncadd (%p600_p4), %s163_s28, 4294967264 }
  0x22   : > { %509 = dma.done.wait (%p590_p1), [#allocation6], 32  }
  0x23   : > { %511 = vsyncadd (%p590_p1), [#allocation6], 4294967264  ;;  %s316_s24 = sshll.u32 %s530_s12, 1  ;;  %s192_s7 = scalar_lea.vmem [#allocation7], %s312_s26  ;;  %v193_v0 = vld [vmem:[%s166_s3] sm:$0x3] }
  0x24   : > { %s209_s5 = scalar_lea.hbm %s707_s2, %s316_s24  ;;  %s211_s8 = sshll.u32 %s192_s7, 4  ;;  %v194_v1 = vld [vmem:[#allocation5] sm:$0x3]  ;;  %s212_s8 = int_to_ptr.vmem [resolvable:$true] %s211_s8 }
  0x25   : > { %s213_s15 = sshll.u32 %s209_s5, 4  ;;  %v195_v2 = vadd.f32 %v194_v1, %v193_v0  ;;  %s198_s19 = scalar_lea.sflag [#allocation4], %s655_s25  ;;  %s214_s15 = int_to_ptr.hbm [resolvable:$true] %s213_s15 }
  0x26   : > { %s466_s17 = sshra.s32 %s214_s15, 4  ;;  %s472_s22 = scalar_lea.hbm %s707_s2, 4  ;;  %s467_s17 = int_to_ptr.hbm [resolvable:$true] %s466_s17 }
  0x27   : > { %196 = vst [vmem:[%s192_s7] sm:$0x3] %v195_v2  ;;  %s468_s16 = scalar_lea.hbm %s467_s17, 2  ;;  %p473_p11 = scmp.lt.s32.totalorder %s467_s17, %s707_s2 }
  0x28   : > { %p469_p1 = scmp.ne.s32.totalorder %s467_s17, %s468_s16  ;;  %p474_p12 = scmp.lt.s32.totalorder %s472_s22, %s468_s16 }
  0x2a   : > { %p470_p4 = pnand %p469_p1, %p635_p5  ;;  %p475_p13 = por %p474_p12, %p473_p11 }
  0x2c   : > { %p471_p8 = pneg %p470_p4 }
  0x2e   : > { %p476_p0 = pnand %p475_p13, %p471_p8 }
  0x30   : > { %479 = shalt.err (!%p476_p0)
}
  0x31   : > { %325 = dma.vmem_to_hbm [thread:$0]  (%p635_p5), %s212_s8, 32, %s214_s15, %s198_s19  }
  0x32 PF: > { %s225_s25 = sand.u32 1, %s518_s9   ;;  %p336_p3 = pnand %p308_p9, %p605_p6 }
  0x33   : > { %s226_s26 = scalar_lea.sflag [#allocation4], %s225_s25 }
  0x34   : > { %p337_p7 = pneg %p336_p3 }
  0x36   : > { %513 = dma.done.wait (%p337_p7), %s226_s26, 32  }
  0x37   : > { %515 = vsyncadd (%p337_p7), %s226_s26, 4294967264  ;;  %s19_s14 = sadd.s32 1, %s538_s14   ;;  %s715_s9 = smov %s522_s10 }
  0x38   : > { %p16_p10 = scmp.ge.s32.totalorder %s19_s14, 4   ;;  %s716_s10 = smov %s526_s11 }
  0x39   : > { %s717_s11 = smov %s644_s6  ;;  %s718_s12 = smov %s534_s13 }
  0x3a   : > { %s719_s13 = smov %s721_s27  ;;  %18 = sbr.rel (!%p16_p10) target bundleno = 7 (0x7), region = 77 }
  0x3f   :  { %232 = vsyncpa [#allocation3], 1 }
  0x40   :  { %234 = vsyncpa [#allocation3 + $0x1], 1 }
  0x41   :  { %235 = vsyncpa [#allocation6], 1 }
  0x42   :  { %236 = vsyncpa [#allocation4], 1 }
  0x43   :  { %238 = vsyncpa [#allocation4 + $0x1], 1 }

</bundles_post_ra>
